<compile_context>
chip_gen: v7x
topology: tpu7x:2x2x1
jax: 0.10.0
libtpu: 0.0.40
codegen_flags: <defaults>
</compile_context>

<pallas_src>
import jax
import jax.numpy as jnp
from jax.experimental import pallas as pl
from jax.experimental.pallas import tpu as pltpu


def _vmem_budgets():
    """Generation-aware VMEM budgets (tile budget, vmem_limit_bytes)."""
    try:
        vmem_cap = int(pltpu.get_tpu_info().vmem_capacity_bytes)
    except Exception:
        vmem_cap = 64 * 1024 * 1024  # conservative (v7x per-TC) fallback
    # v5e/v6e (128 MiB): limit ~96 MiB, tiles ~48 MiB.
    # v7x   (64 MiB):    limit ~48 MiB, tiles ~24 MiB.
    vmem_limit = min(int(vmem_cap * 3 // 4), 100 * 1024 * 1024)
    tile_budget = min(vmem_limit // 2, 48 * 1024 * 1024)
    return tile_budget, vmem_limit


def _choose_batch_block(B, N, D, itemsize, tile_budget):
    """Largest dtype-aligned batch block whose tiles + temporaries fit VMEM."""
    # Sublane alignment for the (TB, D) wrt/out blocks: 8 for 4-byte dtypes,
    # 16 for 2-byte, 32 for 1-byte.
    sublane = max(8, 32 // max(1, itemsize))

    # Per batch row: double-buffered pipeline tiles (2x cand, 2x wrt, 2x out)
    # plus in-kernel temporaries (native-dtype product, f32 scores/e/target).
    per_row = itemsize * (2 * N * D + 4 * D)   # pipeline buffers
    per_row += itemsize * N * D                # cand * wrt / w * cand product
    per_row += 4 * (2 * N + 2 * D)             # f32 scores, e, target
    per_row += 512                             # slack for small compiler temps
    max_tb = max(1, int(tile_budget // per_row))

    if B <= sublane:
        # Tiny batch: one full-batch block (block == array dim is always legal).
        return B

    tb = min(max_tb, B)
    tb = max((tb // sublane) * sublane, sublane)

    # Prefer >= 2 grid steps (v7x has 2 TensorCores; "parallel" can only shard
    # an axis with >= 2 steps) when the batch is large enough to keep blocks
    # sublane-aligned.
    if tb >= B and B >= 2 * sublane:
        half = -(-B // 2)  # ceil(B / 2)
        tb = min(((half + sublane - 1) // sublane) * sublane, tb)

    return tb


def _similarity_attention_kernel(wrt_ref, cand_ref, out_ref):
    # wrt_ref:  (TB, D)      out_ref: (TB, D)      cand_ref: (TB, N, D)
    cand = cand_ref[...]                                   # native dtype
    wrt = wrt_ref[...]                                     # native dtype

    # scores[b, n] = <cand[b, n, :], wrt[b, :]>; multiply stays in the input
    # dtype, the reduction accumulates in f32. Keepdims keeps N on sublanes so
    # the softmax and the weighted sum share a layout (no XLU relayout).
    scores = jnp.sum(cand * wrt[:, None, :], axis=-1, keepdims=True,
                     dtype=jnp.float32)                    # (TB, N, 1) f32

    # Numerically stable softmax over the candidate axis.
    m = jnp.max(scores, axis=1, keepdims=True)             # (TB, 1, 1)
    e = jnp.exp(scores - m)                                # (TB, N, 1) f32
    denom = jnp.sum(e, axis=1, keepdims=True)              # (TB, 1, 1)

    # Deferred normalization: unnormalized weighted sum accumulated in f32;
    # the large elementwise multiply runs in the input dtype (matches the
    # PyTorch bf16 path and keeps the VPU on the packed lane width).
    w = e.astype(cand.dtype)                               # (TB, N, 1)
    target = jnp.sum(w * cand, axis=1, dtype=jnp.float32)  # (TB, D) f32
    target = target * (1.0 / denom[:, 0, :])               # (TB, D) * (TB, 1)

    out_ref[...] = target.astype(out_ref.dtype)


def similarity_attention(wrt_vector, candidate_vector):
    """
    Args:
        wrt_vector:       (B, D)
        candidate_vector: (B, N, D)
    Returns:
        (B, D)
    """
    B, D = wrt_vector.shape
    Bc, N, Dc = candidate_vector.shape
    assert B == Bc and D == Dc

    itemsize = jnp.dtype(candidate_vector.dtype).itemsize
    tile_budget, vmem_limit = _vmem_budgets()
    tb = _choose_batch_block(B, N, D, itemsize, tile_budget)
    grid = (pl.cdiv(B, tb),)

    bytes_accessed = itemsize * (B * N * D + 2 * B * D)
    cost = pl.CostEstimate(
        flops=4 * B * N * D,           # score dot + weighted sum
        transcendentals=B * N,         # exp
        bytes_accessed=bytes_accessed,
    )

    out = pl.pallas_call(
        _similarity_attention_kernel,
        out_shape=jax.ShapeDtypeStruct((B, D), candidate_vector.dtype),
        grid_spec=pltpu.PrefetchScalarGridSpec(
            num_scalar_prefetch=0,
            grid=grid,
            in_specs=[
                pl.BlockSpec((tb, D), lambda i: (i, 0)),
                pl.BlockSpec((tb, N, D), lambda i: (i, 0, 0)),
            ],
            out_specs=pl.BlockSpec((tb, D), lambda i: (i, 0)),
        ),
        compiler_params=pltpu.CompilerParams(
            dimension_semantics=("parallel",),
            vmem_limit_bytes=int(vmem_limit),
        ),
        cost_estimate=cost,
    )(wrt_vector, candidate_vector)

    return out


def _reference(wrt_vector, candidate_vector):
    # Pure-JAX reference matching the PyTorch forward (f32 softmax/accumulate).
    scores = jnp.einsum(
        "bnd,bd->bn",
        candidate_vector.astype(jnp.float32),
        wrt_vector.astype(jnp.float32),
    )
    weights = jax.nn.softmax(scores, axis=1)
    out = jnp.einsum("bn,bnd->bd", weights, candidate_vector.astype(jnp.float32))
    return out.astype(candidate_vector.dtype)


if __name__ == "__main__":
    key = jax.random.PRNGKey(0)
    k1, k2, k3, k4, k5, k6 = jax.random.split(key, 6)

    # Small shapes consistent with the module: batch=2, candidates=8, dim=32.
    B, N, D = 2, 8, 32
    wrt = jax.random.normal(k1, (B, D), dtype=jnp.float32)
    cand = jax.random.normal(k2, (B, N, D), dtype=jnp.float32)

    out = similarity_attention(wrt, cand)
    jax.block_until_ready(out)

    ref = _reference(wrt, cand)
    assert out.shape == (B, D)
    assert jnp.allclose(out, ref, atol=1e-5, rtol=1e-5), (
        f"mismatch: max abs err {jnp.max(jnp.abs(out - ref))}")

    # Larger case: exercises the multi-step, sublane-aligned batch-blocked path.
    B2, N2, D2 = 16, 64, 128
    wrt2 = jax.random.normal(k3, (B2, D2), dtype=jnp.float32)
    cand2 = jax.random.normal(k4, (B2, N2, D2), dtype=jnp.float32)
    out2 = similarity_attention(wrt2, cand2)
    jax.block_until_ready(out2)
    ref2 = _reference(wrt2, cand2)
    assert jnp.allclose(out2, ref2, atol=1e-4, rtol=1e-4), (
        f"mismatch (large): max abs err {jnp.max(jnp.abs(out2 - ref2))}")

    # Ragged batch: exercises the cdiv grid + padded final block.
    B3, N3, D3 = 13, 32, 64
    wrt3 = jax.random.normal(k5, (B3, D3), dtype=jnp.float32)
    cand3 = jax.random.normal(k6, (B3, N3, D3), dtype=jnp.float32)
    out3 = similarity_attention(wrt3, cand3)
    jax.block_until_ready(out3)
    ref3 = _reference(wrt3, cand3)
    assert jnp.allclose(out3, ref3, atol=1e-4, rtol=1e-4), (
        f"mismatch (ragged): max abs err {jnp.max(jnp.abs(out3 - ref3))}")

    print("KERNEL_OK")
</pallas_src>

<mosaic_0001>
module attributes {stable_mosaic.version = 11 : i64} {
  func.func @_similarity_attention_kernel(%arg0: i32, %arg1: memref<2x32xf32, #tpu.memory_space<vmem>>, %arg2: memref<2x8x32xf32, #tpu.memory_space<vmem>>, %arg3: memref<2x32xf32, #tpu.memory_space<vmem>>) attributes {dimension_semantics = [#tpu.dimension_semantics<parallel>], iteration_bounds = array<i64: 1>, scalar_prefetch = 0 : i64, scratch_operands = 0 : i64, tpu.core_type = #tpu.core_type<tc>, window_params = [{transform_indices = @transform_0, window_bounds = array<i64: 2, 32>}, {transform_indices = @transform_1, window_bounds = array<i64: 2, 8, 32>}, {transform_indices = @transform_2, window_bounds = array<i64: 2, 32>}]} {
    %c0 = arith.constant 0 : index
    %c0_0 = arith.constant 0 : index
    %c0_1 = arith.constant 0 : index
    %0 = vector.load %arg2[%c0, %c0_0, %c0_1] : memref<2x8x32xf32, #tpu.memory_space<vmem>>, vector<2x8x32xf32>
    %c0_2 = arith.constant 0 : index
    %c0_3 = arith.constant 0 : index
    %1 = vector.load %arg1[%c0_2, %c0_3] : memref<2x32xf32, #tpu.memory_space<vmem>>, vector<2x32xf32>
    %2 = vector.shape_cast %1 : vector<2x32xf32> to vector<2x1x32xf32>
    %3 = vector.broadcast %2 : vector<2x1x32xf32> to vector<2x8x32xf32>
    %4 = arith.mulf %0, %3 : vector<2x8x32xf32>
    %cst = arith.constant dense<0.000000e+00> : vector<2x8xf32>
    %5 = vector.multi_reduction <add>, %4, %cst [2] : vector<2x8x32xf32> to vector<2x8xf32>
    %6 = vector.shape_cast %5 : vector<2x8xf32> to vector<2x8x1xf32>
    %cst_4 = arith.constant dense<0xFF800000> : vector<2x1xf32>
    %7 = vector.multi_reduction <maximumf>, %6, %cst_4 [1] : vector<2x8x1xf32> to vector<2x1xf32>
    %8 = vector.shape_cast %7 : vector<2x1xf32> to vector<2x1x1xf32>
    %9 = vector.broadcast %8 : vector<2x1x1xf32> to vector<2x8x1xf32>
    %10 = arith.subf %6, %9 : vector<2x8x1xf32>
    %11 = math.exp %10 : vector<2x8x1xf32>
    %cst_5 = arith.constant dense<0.000000e+00> : vector<2x1xf32>
    %12 = vector.multi_reduction <add>, %11, %cst_5 [1] : vector<2x8x1xf32> to vector<2x1xf32>
    %13 = vector.shape_cast %12 : vector<2x1xf32> to vector<2x1x1xf32>
    %14 = vector.broadcast %11 : vector<2x8x1xf32> to vector<2x8x32xf32>
    %15 = arith.mulf %14, %0 : vector<2x8x32xf32>
    %cst_6 = arith.constant dense<0.000000e+00> : vector<2x32xf32>
    %16 = vector.multi_reduction <add>, %15, %cst_6 [1] : vector<2x8x32xf32> to vector<2x32xf32>
    %17 = vector.shape_cast %13 : vector<2x1x1xf32> to vector<2x1xf32>
    %cst_7 = arith.constant 1.000000e+00 : f32
    %18 = vector.broadcast %cst_7 : f32 to vector<2x1xf32>
    %19 = arith.divf %18, %17 : vector<2x1xf32>
    %20 = vector.broadcast %19 : vector<2x1xf32> to vector<2x32xf32>
    %21 = arith.mulf %16, %20 : vector<2x32xf32>
    %c0_8 = arith.constant 0 : index
    %c0_9 = arith.constant 0 : index
    %22 = vector.load %arg3[%c0_8, %c0_9] : memref<2x32xf32, #tpu.memory_space<vmem>>, vector<2x32xf32>
    tpu.vector_store %arg3[%c0_8, %c0_9], %21 {strides = array<i32>} : memref<2x32xf32, #tpu.memory_space<vmem>>, vector<2x32xf32>,
    return
  }
  func.func @transform_0(%arg0: i32) -> (i32, i32) {
    %c0_i32 = arith.constant 0 : i32
    %c0_i32_0 = arith.constant 0 : i32
    return %arg0, %c0_i32 : i32, i32
  }
  func.func @transform_1(%arg0: i32) -> (i32, i32, i32) {
    %c0_i32 = arith.constant 0 : i32
    %c0_i32_0 = arith.constant 0 : i32
    %c0_i32_1 = arith.constant 0 : i32
    return %arg0, %c0_i32, %c0_i32_0 : i32, i32, i32
  }
  func.func @transform_2(%arg0: i32) -> (i32, i32) {
    %c0_i32 = arith.constant 0 : i32
    %c0_i32_0 = arith.constant 0 : i32
    return %arg0, %c0_i32 : i32, i32
  }
}

</mosaic_0001>

<bundles_post_ra>
// kernel: tpu_custom_call.1
= control target key start
LH: loop header
LB: loop body
LE: loop exit
PB: predicated region body
PF: predicated region fallthrough
CT: control target
= control target key end

     0   :  { %7 = vsyncpa [#allocation3], 0  ;;  %s313_s0 = inlined_call_operand.hbm [shape: f32[2,32], index: 0, kind: input, shape index: {}]   ;;  %s314_s1 = inlined_call_operand.hbm [shape: f32[2,8,32], index: 1, kind: input, shape index: {}]   ;;  %s315_s2 = inlined_call_operand.hbm [shape: f32[2,32], index: 2, kind: output, shape index: {}]  }
   0x1   :  { %8 = vsyncpa [#allocation6], 0 }
   0x2   :  { %9 = vsyncpa [#allocation4], 0  ;;  %s245_s9 = smov [#allocation2]   ;;  %s246_s11 = smov [#allocation5]  }
   0x3   :  { %s16_s10 = sshll.u32 %s245_s9, 4  ;;  %s25_s12 = sshll.u32 %s246_s11, 4  ;;  %s17_s10 = int_to_ptr.vmem [resolvable:$true] %s16_s10  ;;  %s266_s12 = int_to_ptr.vmem [resolvable:$true] %s25_s12 }
   0x4   :  { %s173_s15 = scalar_lea.hbm %s313_s0, 32 }
   0x5   :  { %p174_p0 = scmp.ne.s32.totalorder %s313_s0, %s173_s15  ;;  %p177_p1 = scmp.lt.u32.totalorder %s173_s15, %s313_s0 }
   0x7   :  { %p179_p2 = pnand %p177_p1, %p174_p0 }
   0x9   :  { %182 = shalt.err (!%p179_p2)
}
   0xa   :  { %s183_s20 = scalar_lea.vmem %s17_s10, 32  ;;  %p188_p4 = scmp.lt.s32.totalorder %s17_s10, %s17_s10 }
   0xb   :  { %p184_p3 = scmp.ne.s32.totalorder %s17_s10, %s183_s20  ;;  %p189_p5 = scmp.lt.s32.totalorder %s183_s20, %s183_s20 }
   0xd   :  { %p190_p6 = por %p189_p5, %p188_p4 }
   0xf   :  { %p191_p7 = pnand %p190_p6, %p184_p3 }
  0x11   :  { %194 = shalt.err (!%p191_p7)
}
  0x12   :  { %19 = dma.hbm_to_vmem [thread:$0]  %s313_s0, 32, %s17_s10, [#allocation3]  }
  0x13   :  { %s195_s25 = scalar_lea.hbm %s314_s1, 256 }
  0x14   :  { %p196_p8 = scmp.ne.s32.totalorder %s314_s1, %s195_s25  ;;  %p199_p9 = scmp.lt.u32.totalorder %s195_s25, %s314_s1 }
  0x16   :  { %p201_p10 = pnand %p199_p9, %p196_p8 }
  0x18   :  { %204 = shalt.err (!%p201_p10)
}
  0x19   :  { %s205_s30 = scalar_lea.vmem %s266_s12, 256  ;;  %p210_p12 = scmp.lt.s32.totalorder %s266_s12, %s266_s12 }
  0x1a   :  { %p206_p11 = scmp.ne.s32.totalorder %s266_s12, %s205_s30  ;;  %p211_p13 = scmp.lt.s32.totalorder %s205_s30, %s205_s30 }
  0x1c   :  { %p212_p0 = por %p211_p13, %p210_p12 }
  0x1e   :  { %p213_p1 = pnand %p212_p0, %p206_p11 }
  0x20   :  { %216 = shalt.err (!%p213_p1)
}
  0x21   :  { %s247_s0 = smov 128   ;;  %s248_s3 = smov 8  }
  0x22   :  { %31 = dma.hbm_to_vmem [thread:$0]  %s314_s1, 256, %s266_s12, [#allocation6], %s247_s0, %s247_s0, %s248_s3  }
  0x23   :  { %239 = dma.done.wait [#allocation3], 32  }
  0x24   :  { %240 = vsyncadd [#allocation3], 4294967264 }
  0x25   :  { %241 = dma.done.wait [#allocation6], 256  }
  0x26   :  { %242 = vsyncadd [#allocation6], 4294967040  ;;  %v53_v0 = vlaneseq  ;;  %v249_v1 = vmov 1966171168   ;;  %v38_v10 = vld [vmem:[#allocation5] sm:$0xff]  ;;  %vm76_vm0 = vcmask 261120  }
  0x27   :  { %v51_v2 = vunpack.c.l.s4 %v249_v1  ;;  %v158_v7 = vld.sshfl [vmem:[#allocation2] sm:$0x11 pattern:$0x75316420]  ;;  %v39_v13 = vld [vmem:[#allocation5 + $0x8] sm:$0xff]  ;;  %s250_s1 = smov [#allocation7]  }
  0x28   :  { %v54_v3 = vshrl.u32 %v53_v0, 7  ;;  %v49_v8 = vcombine.high %v158_v7, %v158_v7  ;;  %s148_s6 = sshll.u32 %s250_s1, 4  ;;  %vm137_vm1 = vcmask 1041409   ;;  %vm140_vm2 = vcmask 254976   ;;  %s149_s6 = int_to_ptr.vmem [resolvable:$true] %s148_s6 }
  0x29   :  { %v52_v4 = vunpack.c.0.s8 %v51_v2  ;;  %s217_s7 = scalar_lea.vmem %s149_s6, 32  ;;  %p222_p3 = scmp.lt.s32.totalorder %s149_s6, %s149_s6 }
  0x2a   :  { %v66_v6 = vsub.s32 0, %v54_v3  ;;  %p218_p2 = scmp.ne.s32.totalorder %s149_s6, %s217_s7  ;;  %p223_p4 = scmp.lt.s32.totalorder %s217_s7, %s217_s7 }
  0x2b   :  { %v55_v5 = vsub.s32 %v52_v4, %v54_v3 }
  0x2c   :  { %p224_p5 = por %p223_p4, %p222_p3 }
  0x2d   :  { %v56_v9 = vrot.slane %v158_v7, %v55_v5  ;;  %v63_v12 = vrot.slane %v49_v8, %v55_v5 }
  0x2e   :  { %p225_p6 = pnand %p224_p5, %p218_p2 }
  0x2f   :  { %v67_v11 = vrot.slane %v56_v9, %v66_v6  ;;  %v71_v15 = vrot.slane %v63_v12, %v66_v6 }
  0x31   :  { %v74_v14 = vmul.f32 %v67_v11, %v38_v10  ;;  %v75_v17 = vmul.f32 %v71_v15, %v39_v13 }
  0x33   :  { %v77_v16 = vsel %vm76_vm0, %v74_v14, 0.0  ;;  %v80_v18 = vsel %vm76_vm0, %v75_v17, 0.0 }
  0x34   :  { %78 = vadd.xlane.f32.xlu0 %v77_v16 }
  0x38   :  { %81 = vadd.xlane.f32.xlu0 %v80_v18 }
  0xc1   :  { %v79_v19 = vpop.xlane.xlu0 %78 }
  0xc2   :  { %v83_v20 = vrot.slane %v79_v19, 4 }
  0xc4   :  { %v84_v21 = vmax.f32 %v79_v19, %v83_v20 }
  0xc5   :  { %v82_v22 = vpop.xlane.xlu0 %81 }
  0xc6   :  { %v85_v23 = vrot.slane %v84_v21, 2  ;;  %v89_v24 = vrot.slane %v82_v22, 4 }
  0xc8   :  { %v86_v25 = vmax.f32 %v84_v21, %v85_v23  ;;  %v90_v26 = vmax.f32 %v82_v22, %v89_v24 }
  0xca   :  { %v87_v27 = vrot.slane %v86_v25, 1  ;;  %v91_v28 = vrot.slane %v90_v26, 2 }
  0xcc   :  { %v88_v29 = vmax.f32 %v86_v25, %v87_v27  ;;  %v92_v30 = vmax.f32 %v90_v26, %v91_v28 }
  0xce   :  { %v95_v31 = vsub.f32 %v79_v19, %v88_v29  ;;  %v93_v32 = vrot.slane %v92_v30, 1 }
  0xd0   :  { %v97_v33 = vmul.f32 1.442695, %v95_v31  ;;  %v94_v34 = vmax.f32 %v92_v30, %v93_v32 }
  0xd2   :  { %165 = vpow2.f32 %v97_v33  ;;  %v96_v35 = vsub.f32 %v82_v22, %v94_v34 }
  0xd4   :  { %v99_v36 = vmul.f32 1.442695, %v96_v35 }
  0xd6   :  { %167 = vpow2.f32 %v99_v36 }
  0xdc   :  { %v166_v37 = vpop.eup %165 }
  0xdd   :  { %v101_v38 = vrot.slane %v166_v37, 4  ;;  %v113_v39 = vmul.f32 %v166_v37, %v38_v10 }
  0xdf   :  { %v102_v40 = vadd.f32 %v166_v37, %v101_v38  ;;  %v115_v41 = vsel %vm76_vm0, %v113_v39, 0.0 }
  0xe0   :  { %v168_v42 = vpop.eup %167  ;;  %v116_v46 = vrot.slane %v115_v41, 4 }
  0xe1   :  { %v103_v43 = vrot.slane %v102_v40, 2  ;;  %v107_v44 = vrot.slane %v168_v42, 4  ;;  %v114_v45 = vmul.f32 %v168_v42, %v39_v13 }
  0xe2   :  { %v117_v53 = vadd.f32 %v116_v46, %v115_v41 }
  0xe3   :  { %v104_v47 = vadd.f32 %v103_v43, %v102_v40  ;;  %v108_v48 = vadd.f32 %v168_v42, %v107_v44  ;;  %v122_v49 = vsel %vm76_vm0, %v114_v45, 0.0 }
  0xe4   :  { %v123_v50 = vrot.slane %v122_v49, 4  ;;  %v118_v58 = vrot.slane %v117_v53, 2 }
  0xe5   :  { %v105_v51 = vrot.slane %v104_v47, 1  ;;  %v109_v52 = vrot.slane %v108_v48, 2 }
  0xe6   :  { %v124_v54 = vadd.f32 %v123_v50, %v122_v49  ;;  %v119_v61 = vadd.f32 %v118_v58, %v117_v53 }
  0xe7   :  { %v106_v55 = vadd.f32 %v105_v51, %v104_v47  ;;  %v110_v56 = vadd.f32 %v109_v52, %v108_v48 }
  0xe8   :  { %v125_v59 = vrot.slane %v124_v54, 2  ;;  %v120_v63 = vrot.slane %v119_v61, 1 }
  0xe9   :  { %v111_v57 = vrot.slane %v110_v56, 1  ;;  %169 = vrcp.f32 %v106_v55 }
  0xea   :  { %v126_v62 = vadd.f32 %v125_v59, %v124_v54  ;;  %v121_v2 = vadd.f32 %v120_v63, %v119_v61 }
  0xeb   :  { %v112_v60 = vadd.f32 %v111_v57, %v110_v56 }
  0xec   :  { %v127_v0 = vrot.slane %v126_v62, 1 }
  0xed   :  { %171 = vrcp.f32 %v112_v60 }
  0xee   :  { %v128_v3 = vadd.f32 %v127_v0, %v126_v62 }
  0xf3   :  { %v170_v1 = vpop.eup %169 }
  0xf4   :  { %v133_v5 = vmul.f32 %v170_v1, %v121_v2 }
  0xf7   :  { %v172_v4 = vpop.eup %171 }
  0xf8   :  { %v134_v6 = vmul.f32 %v172_v4, %v128_v3 }
  0xfa   :  { %v138_v7 = vsel %vm137_vm1, %v134_v6, %v133_v5 }
  0xfb   :  { %141 = vst.msk [vmem:[#allocation7] sm:$0x3] %vm140_vm2, %v138_v7 }
  0xfc   :  { %228 = shalt.err (!%p225_p6)
}
  0xfd   :  { %s229_s10 = scalar_lea.hbm %s315_s2, 32 }
  0xfe   :  { %p230_p7 = scmp.ne.s32.totalorder %s315_s2, %s229_s10  ;;  %p233_p8 = scmp.lt.u32.totalorder %s229_s10, %s315_s2 }
 0x100   :  { %p235_p9 = pnand %p233_p8, %p230_p7 }
 0x102   :  { %238 = shalt.err (!%p235_p9)
}
 0x103   :  { %151 = dma.vmem_to_hbm [thread:$0]  %s149_s6, 32, %s315_s2, [#allocation4]  }
 0x104   :  { %243 = dma.done.wait [#allocation4], 32  }
 0x105   :  { %244 = vsyncadd [#allocation4], 4294967264 }
 0x106   :  { %155 = vsyncpa [#allocation3], 1 }
 0x107   :  { %156 = vsyncpa [#allocation6], 1 }
 0x108   :  { %157 = vsyncpa [#allocation4], 1 }

</bundles_post_ra>
